<compile_context>
chip_gen: v6e
topology: v6e:2x2x1
jax: 0.10.0
libtpu: 0.0.40
codegen_flags: <defaults>
</compile_context>

<pallas_src>
import numpy as np
import jax
import jax.numpy as jnp
from jax import lax
from jax.experimental import pallas as pl
from jax.experimental.pallas import tpu as pltpu

BN_EPS = 1e-5
KSIZE = 3
STRIDE = 2

_VMEM = pl.BlockSpec(memory_space=pltpu.MemorySpace.VMEM)


def _out_size(n):
    return (n - KSIZE) // STRIDE + 1


# --------------------- host-side (weight-only) folding ---------------------- #

def _fold_conv_weight(w_oihw, w_in, c_in, w_out, c_out):
    """Fold kw-tap gather + channel contraction of a 3x3 stride-2 conv and
    stack the 3 kh taps along rows.

    Returns F with
      F[kh*w_in*c_in + w*c_in + c, ow*c_out + d] = W[d, c, kh, w - 2*ow]
    (zero where the tap is out of range), so one conv layer becomes a single
      gathered @ F
    where gathered has rows=(b, oh) and lanes=(kh, w_in, c_in).
    """
    w_t = np.transpose(np.asarray(w_oihw, np.float32), (2, 3, 1, 0))  # (kh,kw,cin,cout)
    sel = np.zeros((KSIZE, w_in, w_out), np.float32)                  # sel[kw, win, wout]
    for kw in range(KSIZE):
        for ow in range(w_out):
            sel[kw, STRIDE * ow + kw, ow] = 1.0
    f = np.einsum("kwo,hkcd->hwcod", sel, w_t)        # (kh, w_in, c_in, w_out, c_out)
    return np.ascontiguousarray(
        f.reshape(KSIZE * w_in * c_in, w_out * c_out)).astype(np.float32)


def _bn_reduce_matrix(w_out, c_out):
    """One-hot reduce matrix: RED[w*c_out + c, c] = 1 (its transpose replicates)."""
    red = np.zeros((w_out * c_out, c_out), np.float32)
    for wq in range(w_out):
        for c in range(c_out):
            red[wq * c_out + c, c] = 1.0
    return red


def _pack_constants(pieces):
    """Pack named 2-D constants into one lane-dense f32 slab.

    Each piece is padded to a multiple of 8 rows and the common (128-multiple)
    lane width; offsets record (row_offset, rows, cols) for static in-kernel
    ref slices.
    """
    width = 128 * int(np.ceil(max(p.shape[1] for _, p in pieces) / 128))
    offsets, blocks, rows = {}, [], 0
    for name, arr in pieces:
        arr = np.asarray(arr, np.float32)
        r, c = arr.shape
        r_pad = int(np.ceil(r / 8) * 8)
        buf = np.zeros((r_pad, width), np.float32)
        buf[:r, :c] = arr
        offsets[name] = (rows, r, c)
        rows += r_pad
        blocks.append(buf)
    slab = np.concatenate(blocks, axis=0)
    return jnp.asarray(slab), offsets


def _fold_encoder(params, batch, height, width):
    conv_layers = params["conv"]
    w_mu, b_mu, w_ls, b_ls = params["heads"]
    hidden = int(w_mu.shape[0])
    head_cols = ((2 * hidden + 127) // 128) * 128

    pieces, layers = [], []
    h_in, w_in, c_in = height, width, 1
    for li, (w_conv, _b_conv, gamma, beta) in enumerate(conv_layers):
        # _b_conv intentionally dropped: cancelled exactly by train-mode BN.
        c_out = int(w_conv.shape[0])
        h_out, w_out = _out_size(h_in), _out_size(w_in)
        pieces.append((f"F{li}", _fold_conv_weight(w_conv, w_in, c_in, w_out, c_out)))
        red = _bn_reduce_matrix(w_out, c_out)
        pieces.append((f"RED{li}", red))
        pieces.append((f"REP{li}", np.ascontiguousarray(red.T)))
        pieces.append((f"BN{li}", np.stack([np.asarray(gamma, np.float32),
                                            np.asarray(beta, np.float32)])))
        layers.append(dict(h_in=h_in, w_in=w_in, c_in=c_in,
                           h_out=h_out, w_out=w_out, c_out=c_out))
        h_in, w_in, c_in = h_out, w_out, c_out

    wh = np.zeros((c_in, head_cols), np.float32)
    wh[:, :hidden] = np.asarray(w_mu, np.float32).T
    wh[:, hidden:2 * hidden] = np.asarray(w_ls, np.float32).T
    bh = np.zeros((1, head_cols), np.float32)
    bh[0, :hidden] = np.asarray(b_mu, np.float32)
    bh[0, hidden:2 * hidden] = np.asarray(b_ls, np.float32)
    pieces.append(("WH", wh))
    pieces.append(("BH", bh))

    slab, offsets = _pack_constants(pieces)
    meta = dict(batch=batch, height=height, width=width, hidden=hidden,
                head_cols=head_cols, layers=layers, offsets=offsets)
    return slab, meta


# ------------------------------ fused kernel -------------------------------- #

def _make_kernel(meta):
    batch = meta["batch"]
    layers = meta["layers"]
    offsets = meta["offsets"]
    n_layers = len(layers)

    def kernel(x_ref, const_ref, out_ref, *scratch):
        act_scratch = scratch[:n_layers - 1]
        pool_scr = scratch[-1]

        def cget(name):
            r0, r, c = offsets[name]
            return const_ref[r0:r0 + r, 0:c]

        act = None
        for li, L in enumerate(layers):
            h_in, c_in = L["h_in"], L["c_in"]
            h_out, w_out, c_out = L["h_out"], L["w_out"], L["c_out"]
            src_ref = x_ref if li == 0 else act_scratch[li - 1]

            # --- stride-2 row gather (strided ref reads); 3 kh taps -> lanes ---
            taps = []
            for kh in range(KSIZE):
                blocks = [src_ref[pl.ds(b * h_in + kh, h_out, stride=STRIDE), :]
                          for b in range(batch)]
                taps.append(blocks[0] if batch == 1 else jnp.concatenate(blocks, axis=0))
            gathered = taps[0] if KSIZE == 1 else jnp.concatenate(taps, axis=1)
            # gathered: (B*h_out, KSIZE*w_in*c_in)

            # --- one conv matmul per layer (kh taps folded into rows of F) ---
            y = jnp.dot(gathered, cget(f"F{li}"),
                        preferred_element_type=jnp.float32)   # (B*h_out, w_out*c_out)

            # --- train-mode BatchNorm (biased batch stats) + ReLU ------------
            count = float(batch * h_out * w_out)
            s = jnp.sum(y, axis=0, keepdims=True)
            ss = jnp.sum(y * y, axis=0, keepdims=True)
            stats = jnp.concatenate([s, ss], axis=0)           # (2, w_out*c_out)
            cstats = jnp.dot(stats, cget(f"RED{li}"),
                             preferred_element_type=jnp.float32)   # (2, c_out)
            mean = cstats[0:1, :] / count
            var = jnp.maximum(cstats[1:2, :] / count - mean * mean, 0.0)
            gb = cget(f"BN{li}")                               # rows: [gamma; beta]
            scale = gb[0:1, :] * lax.rsqrt(var + BN_EPS)
            shift = gb[1:2, :] - mean * scale
            ssf = jnp.dot(jnp.concatenate([scale, shift], axis=0), cget(f"REP{li}"),
                          preferred_element_type=jnp.float32)  # (2, w_out*c_out)
            act = jnp.maximum(y * ssf[0:1, :] + ssf[1:2, :], 0.0)

            if li < n_layers - 1:
                act_scratch[li][...] = act

        # --- AdaptiveMaxPool2d(1) + Flatten ---------------------------------
        h_l = layers[-1]["h_out"]
        w_l = layers[-1]["w_out"]
        c_l = layers[-1]["c_out"]
        m = act[:, 0:c_l]
        for q in range(1, w_l):                                # max over w lane-groups
            m = jnp.maximum(m, act[:, q * c_l:(q + 1) * c_l])
        pool_scr[...] = m                                      # (B*h_l, c_l)
        feat = pool_scr[pl.ds(0, batch, stride=h_l), :]        # one row per batch
        for r in range(1, h_l):                                # max over h (strided reads)
            feat = jnp.maximum(feat, pool_scr[pl.ds(r, batch, stride=h_l), :])

        # --- fused mu / log_sigma heads: one lane-dense (B, head_cols) store -
        out_ref[...] = jnp.dot(feat, cget("WH"),
                               preferred_element_type=jnp.float32) + cget("BH")

    return kernel


# -------------------------------- wrapper ----------------------------------- #

def make_encoder(params, batch, height, width):
    """Fold weights once, lower the kernel once; returns x -> (mu, log_sigma)."""
    slab, meta = _fold_encoder(params, batch, height, width)
    kernel = _make_kernel(meta)
    layers = meta["layers"]
    hidden = meta["hidden"]
    head_cols = meta["head_cols"]

    scratch_shapes = [pltpu.VMEM((batch * L["h_out"], L["w_out"] * L["c_out"]),
                                 jnp.float32) for L in layers[:-1]]
    scratch_shapes.append(pltpu.VMEM((batch * layers[-1]["h_out"],
                                      layers[-1]["c_out"]), jnp.float32))

    pcall = pl.pallas_call(
        kernel,
        out_shape=jax.ShapeDtypeStruct((batch, head_cols), jnp.float32),
        in_specs=[_VMEM, _VMEM],
        out_specs=_VMEM,
        scratch_shapes=scratch_shapes,
    )

    @jax.jit
    def forward(x, slab_arg):
        xs = x.astype(jnp.float32).reshape(batch * height, width)  # rows=(b,h), lanes=w
        out = pcall(xs, slab_arg)
        return out[:, 0:hidden], out[:, hidden:2 * hidden]

    def encoder(x):
        assert x.shape == (batch, 1, height, width), x.shape
        return forward(x, slab)

    return encoder


# ------------------------- reference (plain JAX) ----------------------------- #

def encoder_reference(x_nchw, params):
    h = x_nchw.astype(jnp.float32)
    for (w, b, gamma, beta) in params["conv"]:
        h = lax.conv_general_dilated(
            h, w, window_strides=(STRIDE, STRIDE), padding="VALID",
            dimension_numbers=("NCHW", "OIHW", "NCHW"),
            precision=lax.Precision.HIGHEST) + b.reshape(1, -1, 1, 1)
        mean = jnp.mean(h, axis=(0, 2, 3), keepdims=True)
        var = jnp.mean((h - mean) ** 2, axis=(0, 2, 3), keepdims=True)
        h = (h - mean) * lax.rsqrt(var + BN_EPS)
        h = h * gamma.reshape(1, -1, 1, 1) + beta.reshape(1, -1, 1, 1)
        h = jnp.maximum(h, 0.0)
    feat = jnp.max(h, axis=(2, 3))
    w_mu, b_mu, w_ls, b_ls = params["heads"]
    mu = jnp.dot(feat, w_mu.T, precision=lax.Precision.HIGHEST) + b_mu
    ls = jnp.dot(feat, w_ls.T, precision=lax.Precision.HIGHEST) + b_ls
    return mu, ls


# --------------------------- deterministic init ------------------------------ #

def init_params(key, conv_dims, hidden_dim):
    conv = []
    in_ch = 1
    for ch in conv_dims:
        key, k1, k2 = jax.random.split(key, 3)
        bound = 1.0 / np.sqrt(in_ch * KSIZE * KSIZE)
        w = jax.random.uniform(k1, (ch, in_ch, KSIZE, KSIZE), jnp.float32, -bound, bound)
        b = jax.random.uniform(k2, (ch,), jnp.float32, -bound, bound)
        conv.append((w, b, jnp.ones((ch,), jnp.float32), jnp.zeros((ch,), jnp.float32)))
        in_ch = ch
    key, k1, k2, k3, k4 = jax.random.split(key, 5)
    bound = 1.0 / np.sqrt(in_ch)
    w_mu = jax.random.uniform(k1, (hidden_dim, in_ch), jnp.float32, -bound, bound)
    b_mu = jax.random.uniform(k2, (hidden_dim,), jnp.float32, -bound, bound)
    w_ls = jax.random.uniform(k3, (hidden_dim, in_ch), jnp.float32, -bound, bound)
    b_ls = jax.random.uniform(k4, (hidden_dim,), jnp.float32, -bound, bound)
    return {"conv": conv, "heads": (w_mu, b_mu, w_ls, b_ls)}


# ----------------------------------- main ------------------------------------ #

if __name__ == "__main__":
    key = jax.random.PRNGKey(0)
    kx, kp = jax.random.split(key)

    B, H, W = 2, 16, 16              # Encoder input is [B x 1 x H x W]
    conv_dims = [8, 16]
    hidden_dim = 32

    x = jax.random.normal(kx, (B, 1, H, W), jnp.float32)
    params = init_params(kp, conv_dims, hidden_dim)

    encoder = make_encoder(params, B, H, W)
    mu, log_sigma = encoder(x)
    jax.block_until_ready((mu, log_sigma))

    assert mu.shape == (B, hidden_dim), mu.shape
    assert log_sigma.shape == (B, hidden_dim), log_sigma.shape

    mu_ref, ls_ref = encoder_reference(x, params)
    assert jnp.allclose(mu, mu_ref, atol=1e-3, rtol=1e-3), \
        float(jnp.max(jnp.abs(mu - mu_ref)))
    assert jnp.allclose(log_sigma, ls_ref, atol=1e-3, rtol=1e-3), \
        float(jnp.max(jnp.abs(log_sigma - ls_ref)))

    print("KERNEL_OK")
</pallas_src>

<mosaic_0001>
module attributes {stable_mosaic.version = 11 : i64} {
  func.func @kernel(%arg0: memref<32x16xf32, #tpu.memory_space<vmem>>, %arg1: memref<384x128xf32, #tpu.memory_space<vmem>>, %arg2: memref<2x128xf32, #tpu.memory_space<vmem>>, %arg3: memref<14x56xf32, #tpu.memory_space<vmem>>, %arg4: memref<6x16xf32, #tpu.memory_space<vmem>>) attributes {dimension_semantics = [], scalar_prefetch = 0 : i64, scratch_operands = 2 : i64, tpu.core_type = #tpu.core_type<tc>} {
    %c0 = arith.constant 0 : index
    %c0_0 = arith.constant 0 : index
    %0 = tpu.strided_load %arg0[%c0, %c0_0] {strides = array<i32: 2, 1>} : memref<32x16xf32, #tpu.memory_space<vmem>>, vector<7x16xf32>
    %c16 = arith.constant 16 : index
    %c0_1 = arith.constant 0 : index
    %1 = tpu.strided_load %arg0[%c16, %c0_1] {strides = array<i32: 2, 1>} : memref<32x16xf32, #tpu.memory_space<vmem>>, vector<7x16xf32>
    %2 = tpu.concatenate %0, %1 in 0 : vector<7x16xf32>, vector<7x16xf32> -> vector<14x16xf32>
    %c1 = arith.constant 1 : index
    %c0_2 = arith.constant 0 : index
    %3 = tpu.strided_load %arg0[%c1, %c0_2] {strides = array<i32: 2, 1>} : memref<32x16xf32, #tpu.memory_space<vmem>>, vector<7x16xf32>
    %c17 = arith.constant 17 : index
    %c0_3 = arith.constant 0 : index
    %4 = tpu.strided_load %arg0[%c17, %c0_3] {strides = array<i32: 2, 1>} : memref<32x16xf32, #tpu.memory_space<vmem>>, vector<7x16xf32>
    %5 = tpu.concatenate %3, %4 in 0 : vector<7x16xf32>, vector<7x16xf32> -> vector<14x16xf32>
    %c2 = arith.constant 2 : index
    %c0_4 = arith.constant 0 : index
    %6 = tpu.strided_load %arg0[%c2, %c0_4] {strides = array<i32: 2, 1>} : memref<32x16xf32, #tpu.memory_space<vmem>>, vector<7x16xf32>
    %c18 = arith.constant 18 : index
    %c0_5 = arith.constant 0 : index
    %7 = tpu.strided_load %arg0[%c18, %c0_5] {strides = array<i32: 2, 1>} : memref<32x16xf32, #tpu.memory_space<vmem>>, vector<7x16xf32>
    %8 = tpu.concatenate %6, %7 in 0 : vector<7x16xf32>, vector<7x16xf32> -> vector<14x16xf32>
    %9 = tpu.concatenate %2, %5, %8 in 1 : vector<14x16xf32>, vector<14x16xf32>, vector<14x16xf32> -> vector<14x48xf32>
    %c0_6 = arith.constant 0 : index
    %c0_7 = arith.constant 0 : index
    %10 = vector.load %arg1[%c0_6, %c0_7] : memref<384x128xf32, #tpu.memory_space<vmem>>, vector<48x56xf32>
    %cst = arith.constant dense<0.000000e+00> : vector<14x56xf32>
    %11 = tpu.matmul %9, %10, %cst {dimension_numbers = #tpu.dot_dimension_numbers<[1], [0], [0], [1], [0, 0, 1, 1], [], []>} : vector<14x48xf32>, vector<48x56xf32>, vector<14x56xf32> -> vector<14x56xf32>
    %cst_8 = arith.constant dense<0.000000e+00> : vector<56xf32>
    %12 = vector.multi_reduction <add>, %11, %cst_8 [0] : vector<14x56xf32> to vector<56xf32>
    %13 = vector.shape_cast %12 : vector<56xf32> to vector<1x56xf32>
    %14 = arith.mulf %11, %11 : vector<14x56xf32>
    %cst_9 = arith.constant dense<0.000000e+00> : vector<56xf32>
    %15 = vector.multi_reduction <add>, %14, %cst_9 [0] : vector<14x56xf32> to vector<56xf32>
    %16 = vector.shape_cast %15 : vector<56xf32> to vector<1x56xf32>
    %17 = tpu.concatenate %13, %16 in 0 : vector<1x56xf32>, vector<1x56xf32> -> vector<2x56xf32>
    %c48 = arith.constant 48 : index
    %c0_10 = arith.constant 0 : index
    %18 = vector.load %arg1[%c48, %c0_10] : memref<384x128xf32, #tpu.memory_space<vmem>>, vector<56x8xf32>
    %cst_11 = arith.constant dense<0.000000e+00> : vector<2x8xf32>
    %19 = tpu.matmul %17, %18, %cst_11 {dimension_numbers = #tpu.dot_dimension_numbers<[1], [0], [0], [1], [0, 0, 1, 1], [], []>} : vector<2x56xf32>, vector<56x8xf32>, vector<2x8xf32> -> vector<2x8xf32>
    %20 = vector.extract_strided_slice %19 {offsets = [0, 0], sizes = [1, 8], strides = [1, 1]} : vector<2x8xf32> to vector<1x8xf32>
    %cst_12 = arith.constant 9.800000e+01 : f32
    %21 = vector.broadcast %cst_12 : f32 to vector<1x8xf32>
    %22 = arith.divf %20, %21 : vector<1x8xf32>
    %23 = vector.extract_strided_slice %19 {offsets = [1, 0], sizes = [1, 8], strides = [1, 1]} : vector<2x8xf32> to vector<1x8xf32>
    %cst_13 = arith.constant 9.800000e+01 : f32
    %24 = vector.broadcast %cst_13 : f32 to vector<1x8xf32>
    %25 = arith.divf %23, %24 : vector<1x8xf32>
    %26 = arith.mulf %22, %22 : vector<1x8xf32>
    %27 = arith.subf %25, %26 : vector<1x8xf32>
    %cst_14 = arith.constant 0.000000e+00 : f32
    %28 = vector.broadcast %cst_14 : f32 to vector<1x8xf32>
    %29 = arith.maximumf %27, %28 : vector<1x8xf32>
    %c112 = arith.constant 112 : index
    %c0_15 = arith.constant 0 : index
    %30 = vector.load %arg1[%c112, %c0_15] : memref<384x128xf32, #tpu.memory_space<vmem>>, vector<2x8xf32>
    %31 = vector.extract_strided_slice %30 {offsets = [0, 0], sizes = [1, 8], strides = [1, 1]} : vector<2x8xf32> to vector<1x8xf32>
    %cst_16 = arith.constant 9.99999974E-6 : f32
    %32 = vector.broadcast %cst_16 : f32 to vector<1x8xf32>
    %33 = arith.addf %29, %32 : vector<1x8xf32>
    %34 = math.rsqrt %33 : vector<1x8xf32>
    %35 = arith.mulf %31, %34 : vector<1x8xf32>
    %36 = vector.extract_strided_slice %30 {offsets = [1, 0], sizes = [1, 8], strides = [1, 1]} : vector<2x8xf32> to vector<1x8xf32>
    %37 = arith.mulf %22, %35 : vector<1x8xf32>
    %38 = arith.subf %36, %37 : vector<1x8xf32>
    %39 = tpu.concatenate %35, %38 in 0 : vector<1x8xf32>, vector<1x8xf32> -> vector<2x8xf32>
    %c104 = arith.constant 104 : index
    %c0_17 = arith.constant 0 : index
    %40 = vector.load %arg1[%c104, %c0_17] : memref<384x128xf32, #tpu.memory_space<vmem>>, vector<8x56xf32>
    %cst_18 = arith.constant dense<0.000000e+00> : vector<2x56xf32>
    %41 = tpu.matmul %39, %40, %cst_18 {dimension_numbers = #tpu.dot_dimension_numbers<[1], [0], [0], [1], [0, 0, 1, 1], [], []>} : vector<2x8xf32>, vector<8x56xf32>, vector<2x56xf32> -> vector<2x56xf32>
    %42 = vector.extract_strided_slice %41 {offsets = [0, 0], sizes = [1, 56], strides = [1, 1]} : vector<2x56xf32> to vector<1x56xf32>
    %43 = vector.broadcast %42 : vector<1x56xf32> to vector<14x56xf32>
    %44 = arith.mulf %11, %43 : vector<14x56xf32>
    %45 = vector.extract_strided_slice %41 {offsets = [1, 0], sizes = [1, 56], strides = [1, 1]} : vector<2x56xf32> to vector<1x56xf32>
    %46 = vector.broadcast %45 : vector<1x56xf32> to vector<14x56xf32>
    %47 = arith.addf %44, %46 : vector<14x56xf32>
    %cst_19 = arith.constant 0.000000e+00 : f32
    %48 = vector.broadcast %cst_19 : f32 to vector<14x56xf32>
    %49 = arith.maximumf %47, %48 : vector<14x56xf32>
    %c0_20 = arith.constant 0 : index
    %c0_21 = arith.constant 0 : index
    %50 = vector.load %arg3[%c0_20, %c0_21] : memref<14x56xf32, #tpu.memory_space<vmem>>, vector<14x56xf32>
    tpu.vector_store %arg3[%c0_20, %c0_21], %49 {strides = array<i32>} : memref<14x56xf32, #tpu.memory_space<vmem>>, vector<14x56xf32>,
    %c0_22 = arith.constant 0 : index
    %c0_23 = arith.constant 0 : index
    %51 = tpu.strided_load %arg3[%c0_22, %c0_23] {strides = array<i32: 2, 1>} : memref<14x56xf32, #tpu.memory_space<vmem>>, vector<3x56xf32>
    %c7 = arith.constant 7 : index
    %c0_24 = arith.constant 0 : index
    %52 = tpu.strided_load %arg3[%c7, %c0_24] {strides = array<i32: 2, 1>} : memref<14x56xf32, #tpu.memory_space<vmem>>, vector<3x56xf32>
    %53 = tpu.concatenate %51, %52 in 0 : vector<3x56xf32>, vector<3x56xf32> -> vector<6x56xf32>
    %c1_25 = arith.constant 1 : index
    %c0_26 = arith.constant 0 : index
    %54 = tpu.strided_load %arg3[%c1_25, %c0_26] {strides = array<i32: 2, 1>} : memref<14x56xf32, #tpu.memory_space<vmem>>, vector<3x56xf32>
    %c8 = arith.constant 8 : index
    %c0_27 = arith.constant 0 : index
    %55 = tpu.strided_load %arg3[%c8, %c0_27] {strides = array<i32: 2, 1>} : memref<14x56xf32, #tpu.memory_space<vmem>>, vector<3x56xf32>
    %56 = tpu.concatenate %54, %55 in 0 : vector<3x56xf32>, vector<3x56xf32> -> vector<6x56xf32>
    %c2_28 = arith.constant 2 : index
    %c0_29 = arith.constant 0 : index
    %57 = tpu.strided_load %arg3[%c2_28, %c0_29] {strides = array<i32: 2, 1>} : memref<14x56xf32, #tpu.memory_space<vmem>>, vector<3x56xf32>
    %c9 = arith.constant 9 : index
    %c0_30 = arith.constant 0 : index
    %58 = tpu.strided_load %arg3[%c9, %c0_30] {strides = array<i32: 2, 1>} : memref<14x56xf32, #tpu.memory_space<vmem>>, vector<3x56xf32>
    %59 = tpu.concatenate %57, %58 in 0 : vector<3x56xf32>, vector<3x56xf32> -> vector<6x56xf32>
    %60 = tpu.concatenate %53, %56, %59 in 1 : vector<6x56xf32>, vector<6x56xf32>, vector<6x56xf32> -> vector<6x168xf32>
    %c120 = arith.constant 120 : index
    %c0_31 = arith.constant 0 : index
    %61 = vector.load %arg1[%c120, %c0_31] : memref<384x128xf32, #tpu.memory_space<vmem>>, vector<168x48xf32>
    %cst_32 = arith.constant dense<0.000000e+00> : vector<6x48xf32>
    %62 = tpu.matmul %60, %61, %cst_32 {dimension_numbers = #tpu.dot_dimension_numbers<[1], [0], [0], [1], [0, 0, 1, 1], [], []>} : vector<6x168xf32>, vector<168x48xf32>, vector<6x48xf32> -> vector<6x48xf32>
    %cst_33 = arith.constant dense<0.000000e+00> : vector<48xf32>
    %63 = vector.multi_reduction <add>, %62, %cst_33 [0] : vector<6x48xf32> to vector<48xf32>
    %64 = vector.shape_cast %63 : vector<48xf32> to vector<1x48xf32>
    %65 = arith.mulf %62, %62 : vector<6x48xf32>
    %cst_34 = arith.constant dense<0.000000e+00> : vector<48xf32>
    %66 = vector.multi_reduction <add>, %65, %cst_34 [0] : vector<6x48xf32> to vector<48xf32>
    %67 = vector.shape_cast %66 : vector<48xf32> to vector<1x48xf32>
    %68 = tpu.concatenate %64, %67 in 0 : vector<1x48xf32>, vector<1x48xf32> -> vector<2x48xf32>
    %c288 = arith.constant 288 : index
    %c0_35 = arith.constant 0 : index
    %69 = vector.load %arg1[%c288, %c0_35] : memref<384x128xf32, #tpu.memory_space<vmem>>, vector<48x16xf32>
    %cst_36 = arith.constant dense<0.000000e+00> : vector<2x16xf32>
    %70 = tpu.matmul %68, %69, %cst_36 {dimension_numbers = #tpu.dot_dimension_numbers<[1], [0], [0], [1], [0, 0, 1, 1], [], []>} : vector<2x48xf32>, vector<48x16xf32>, vector<2x16xf32> -> vector<2x16xf32>
    %71 = vector.extract_strided_slice %70 {offsets = [0, 0], sizes = [1, 16], strides = [1, 1]} : vector<2x16xf32> to vector<1x16xf32>
    %cst_37 = arith.constant 1.800000e+01 : f32
    %72 = vector.broadcast %cst_37 : f32 to vector<1x16xf32>
    %73 = arith.divf %71, %72 : vector<1x16xf32>
    %74 = vector.extract_strided_slice %70 {offsets = [1, 0], sizes = [1, 16], strides = [1, 1]} : vector<2x16xf32> to vector<1x16xf32>
    %cst_38 = arith.constant 1.800000e+01 : f32
    %75 = vector.broadcast %cst_38 : f32 to vector<1x16xf32>
    %76 = arith.divf %74, %75 : vector<1x16xf32>
    %77 = arith.mulf %73, %73 : vector<1x16xf32>
    %78 = arith.subf %76, %77 : vector<1x16xf32>
    %cst_39 = arith.constant 0.000000e+00 : f32
    %79 = vector.broadcast %cst_39 : f32 to vector<1x16xf32>
    %80 = arith.maximumf %78, %79 : vector<1x16xf32>
    %c352 = arith.constant 352 : index
    %c0_40 = arith.constant 0 : index
    %81 = vector.load %arg1[%c352, %c0_40] : memref<384x128xf32, #tpu.memory_space<vmem>>, vector<2x16xf32>
    %82 = vector.extract_strided_slice %81 {offsets = [0, 0], sizes = [1, 16], strides = [1, 1]} : vector<2x16xf32> to vector<1x16xf32>
    %cst_41 = arith.constant 9.99999974E-6 : f32
    %83 = vector.broadcast %cst_41 : f32 to vector<1x16xf32>
    %84 = arith.addf %80, %83 : vector<1x16xf32>
    %85 = math.rsqrt %84 : vector<1x16xf32>
    %86 = arith.mulf %82, %85 : vector<1x16xf32>
    %87 = vector.extract_strided_slice %81 {offsets = [1, 0], sizes = [1, 16], strides = [1, 1]} : vector<2x16xf32> to vector<1x16xf32>
    %88 = arith.mulf %73, %86 : vector<1x16xf32>
    %89 = arith.subf %87, %88 : vector<1x16xf32>
    %90 = tpu.concatenate %86, %89 in 0 : vector<1x16xf32>, vector<1x16xf32> -> vector<2x16xf32>
    %c336 = arith.constant 336 : index
    %c0_42 = arith.constant 0 : index
    %91 = vector.load %arg1[%c336, %c0_42] : memref<384x128xf32, #tpu.memory_space<vmem>>, vector<16x48xf32>
    %cst_43 = arith.constant dense<0.000000e+00> : vector<2x48xf32>
    %92 = tpu.matmul %90, %91, %cst_43 {dimension_numbers = #tpu.dot_dimension_numbers<[1], [0], [0], [1], [0, 0, 1, 1], [], []>} : vector<2x16xf32>, vector<16x48xf32>, vector<2x48xf32> -> vector<2x48xf32>
    %93 = vector.extract_strided_slice %92 {offsets = [0, 0], sizes = [1, 48], strides = [1, 1]} : vector<2x48xf32> to vector<1x48xf32>
    %94 = vector.broadcast %93 : vector<1x48xf32> to vector<6x48xf32>
    %95 = arith.mulf %62, %94 : vector<6x48xf32>
    %96 = vector.extract_strided_slice %92 {offsets = [1, 0], sizes = [1, 48], strides = [1, 1]} : vector<2x48xf32> to vector<1x48xf32>
    %97 = vector.broadcast %96 : vector<1x48xf32> to vector<6x48xf32>
    %98 = arith.addf %95, %97 : vector<6x48xf32>
    %cst_44 = arith.constant 0.000000e+00 : f32
    %99 = vector.broadcast %cst_44 : f32 to vector<6x48xf32>
    %100 = arith.maximumf %98, %99 : vector<6x48xf32>
    %101 = vector.extract_strided_slice %100 {offsets = [0, 0], sizes = [6, 16], strides = [1, 1]} : vector<6x48xf32> to vector<6x16xf32>
    %102 = vector.extract_strided_slice %100 {offsets = [0, 16], sizes = [6, 16], strides = [1, 1]} : vector<6x48xf32> to vector<6x16xf32>
    %103 = arith.maximumf %101, %102 : vector<6x16xf32>
    %104 = vector.extract_strided_slice %100 {offsets = [0, 32], sizes = [6, 16], strides = [1, 1]} : vector<6x48xf32> to vector<6x16xf32>
    %105 = arith.maximumf %103, %104 : vector<6x16xf32>
    %c0_45 = arith.constant 0 : index
    %c0_46 = arith.constant 0 : index
    %106 = vector.load %arg4[%c0_45, %c0_46] : memref<6x16xf32, #tpu.memory_space<vmem>>, vector<6x16xf32>
    tpu.vector_store %arg4[%c0_45, %c0_46], %105 {strides = array<i32>} : memref<6x16xf32, #tpu.memory_space<vmem>>, vector<6x16xf32>,
    %c0_47 = arith.constant 0 : index
    %c0_48 = arith.constant 0 : index
    %107 = tpu.strided_load %arg4[%c0_47, %c0_48] {strides = array<i32: 3, 1>} : memref<6x16xf32, #tpu.memory_space<vmem>>, vector<2x16xf32>
    %c1_49 = arith.constant 1 : index
    %c0_50 = arith.constant 0 : index
    %108 = tpu.strided_load %arg4[%c1_49, %c0_50] {strides = array<i32: 3, 1>} : memref<6x16xf32, #tpu.memory_space<vmem>>, vector<2x16xf32>
    %109 = arith.maximumf %107, %108 : vector<2x16xf32>
    %c2_51 = arith.constant 2 : index
    %c0_52 = arith.constant 0 : index
    %110 = tpu.strided_load %arg4[%c2_51, %c0_52] {strides = array<i32: 3, 1>} : memref<6x16xf32, #tpu.memory_space<vmem>>, vector<2x16xf32>
    %111 = arith.maximumf %109, %110 : vector<2x16xf32>
    %c360 = arith.constant 360 : index
    %c0_53 = arith.constant 0 : index
    %112 = vector.load %arg1[%c360, %c0_53] : memref<384x128xf32, #tpu.memory_space<vmem>>, vector<16x128xf32>
    %cst_54 = arith.constant dense<0.000000e+00> : vector<2x128xf32>
    %113 = tpu.matmul %111, %112, %cst_54 {dimension_numbers = #tpu.dot_dimension_numbers<[1], [0], [0], [1], [0, 0, 1, 1], [], []>} : vector<2x16xf32>, vector<16x128xf32>, vector<2x128xf32> -> vector<2x128xf32>
    %c376 = arith.constant 376 : index
    %c0_55 = arith.constant 0 : index
    %114 = vector.load %arg1[%c376, %c0_55] : memref<384x128xf32, #tpu.memory_space<vmem>>, vector<1x128xf32>
    %115 = vector.broadcast %114 : vector<1x128xf32> to vector<2x128xf32>
    %116 = arith.addf %113, %115 : vector<2x128xf32>
    %c0_56 = arith.constant 0 : index
    %c0_57 = arith.constant 0 : index
    %117 = vector.load %arg2[%c0_56, %c0_57] : memref<2x128xf32, #tpu.memory_space<vmem>>, vector<2x128xf32>
    tpu.vector_store %arg2[%c0_56, %c0_57], %116 {strides = array<i32>} : memref<2x128xf32, #tpu.memory_space<vmem>>, vector<2x128xf32>,
    return
  }
}

</mosaic_0001>

<bundles_post_ra>
// kernel: forward.1
= control target key start
LH: loop header
LB: loop body
LE: loop exit
PB: predicated region body
PF: predicated region fallthrough
CT: control target
= control target key end

     0   :  { %7 = vsyncpa [#allocation5], 0  ;;  %s1124_s0 = inlined_call_operand.hbm [shape: f32[32,16], index: 0, kind: input, shape index: {}]   ;;  %s1125_s1 = inlined_call_operand.hbm [shape: f32[384,128], index: 1, kind: input, shape index: {}]   ;;  %s1126_s2 = inlined_call_operand.vmem [shape: f32[2,128], index: 2, kind: output, shape index: {}]  }
   0x1   :  { %8 = vsyncpa [#allocation7], 0  ;;  %s989_s9 = smov [#allocation4]  }
   0x2   :  { %s14_s10 = sshll.u32 %s989_s9, 4  ;;  %s15_s10 = int_to_ptr.vmem [resolvable:$true] %s14_s10 }
   0x3   :  { %s953_s11 = scalar_lea.vmem %s15_s10, 512  ;;  %p958_p1 = scmp.lt.s32.totalorder %s15_s10, %s15_s10 }
   0x4   :  { %p954_p0 = scmp.ne.s32.totalorder %s15_s10, %s953_s11  ;;  %p959_p2 = scmp.lt.s32.totalorder %s953_s11, %s953_s11 }
   0x6   :  { %p960_p3 = por %p959_p2, %p958_p1 }
   0x8   :  { %p961_p4 = pnand %p960_p3, %p954_p0 }
   0xa   :  { %964 = shalt.err (!%p961_p4)
}
   0xb   :  { %s990_s12 = smov 128   ;;  %s991_s13 = smov 8  }
   0xc   :  { %20 = dma.hbm_to_vmem [thread:$0]  %s1124_s0, 512, %s15_s10, [#allocation5], %s990_s12, %s990_s12, %s991_s13  }
   0xd   :  { %s992_s16 = smov [#allocation6]  }
   0xe   :  { %s26_s17 = sshll.u32 %s992_s16, 4  ;;  %s27_s17 = int_to_ptr.vmem [resolvable:$true] %s26_s17 }
   0xf   :  { %s973_s18 = scalar_lea.vmem %s27_s17, 6144  ;;  %p978_p6 = scmp.lt.s32.totalorder %s27_s17, %s27_s17 }
  0x10   :  { %p974_p5 = scmp.ne.s32.totalorder %s27_s17, %s973_s18  ;;  %p979_p7 = scmp.lt.s32.totalorder %s973_s18, %s973_s18 }
  0x12   :  { %p980_p8 = por %p979_p7, %p978_p6 }
  0x14   :  { %p981_p9 = pnand %p980_p8, %p974_p5 }
  0x16   :  { %984 = shalt.err (!%p981_p9)
}
  0x17   :  { %32 = dma.hbm_to_vmem [thread:$0]  %s1125_s1, 6144, %s27_s17, [#allocation7], %s990_s12, %s990_s12, %s991_s13  }
  0x18   :  { %985 = dma.done.wait [#allocation5], 512  }
  0x19   :  { %986 = vsyncadd [#allocation5], 4294966784 }
  0x1a   :  { %987 = dma.done.wait [#allocation7], 6144  }
  0x1b   :  { %988 = vsyncadd [#allocation7], 4294961152  ;;  %vm45_vm0 = vcmask 1046528   ;;  %v48_v0 = vld [vmem:[#allocation4 + $0x1] ss:$2 sm:$0x7f] }
  0x1c   :  { %v50_v1 = vld [vmem:[#allocation4 + $0x11] ss:$2 sm:$0x7f]  ;;  %v88_v3 = vld [vmem:[#allocation6 + $0x28] sm:$0xff]  ;;  %v87_v4 = vld [vmem:[#allocation6 + $0x20] sm:$0xff]  ;;  %s993_s0 = smov 16  }
  0x1d   :  { %v52_v2 = vrot.slane %v50_v1, 1  ;;  %v56_v5 = vld [vmem:[#allocation4 + $0x2] ss:$2 sm:$0x7f]  ;;  %864 = vmatprep.subr.mxu0 %v88_v3  ;;  %v86_v9 = vld [vmem:[#allocation6 + $0x18] sm:$0xff]  ;;  %v85_v11 = vld [vmem:[#allocation6 + $0x10] sm:$0xff] }
  0x1e   :  { %v58_v6 = vld [vmem:[#allocation4 + $0x12] ss:$2 sm:$0x7f]  ;;  %865 = vmatpush3.msra.mxu0 %v88_v3  ;;  %s994_s1 = smov 32   ;;  %v84_v12 = vld [vmem:[#allocation6 + $0x8] sm:$0xff]  ;;  %v83_v13 = vld [vmem:[#allocation6] sm:$0xff] }
  0x1f   :  { %v54_v7 = vsel %vm45_vm0, %v48_v0, %v52_v2  ;;  %v60_v8 = vrot.slane %v58_v6, 1  ;;  %866 = vmatprep.subr.mxu0 %v87_v4  ;;  %v41_v14 = vld [vmem:[#allocation4 + $0x10] ss:$2 sm:$0x7f]  ;;  %vm77_vm1 = vcmask 130048   ;;  %vm80_vm2 = vcmask 261120  }
  0x20   :  { %64 = vrot.lane.b32.xlu0 %v54_v7, %s993_s0  ;;  %867 = vmatpush3.msra.mxu0 %v87_v4  ;;  %v43_v15 = vrot.slane %v41_v14, 1  ;;  %v39_v16 = vld [vmem:[#allocation4] ss:$2 sm:$0x7f]  ;;  %vm89_vm3 = vcmask 392192   ;;  %v995_v26 = vmov 0.0  }
  0x21   :  { %v62_v10 = vsel %vm45_vm0, %v56_v5, %v60_v8  ;;  %868 = vmatprep.subr.mxu0 %v86_v9  ;;  %v201_v27 = vld [vmem:[#allocation6 + $0x60] sm:$0xff]  ;;  %896 = vmatprep.subr.mxu1 %v995_v26  ;;  %v200_v28 = vld [vmem:[#allocation6 + $0x58] sm:$0xff]  ;;  %v199_v29 = vld [vmem:[#allocation6 + $0x50] sm:$0xff]  ;;  %vm996_vm4 = vmmov 0   ;;  %vm173_vm5 = vcmask 455680   ;;  %vm171_vm6 = vcmask 457728  }
  0x22   :  { %71 = vrot.lane.b32.xlu1 %v62_v10, %s994_s1  ;;  %869 = vmatpush3.msra.mxu0 %v86_v9  ;;  %v46_v17 = vsel %vm45_vm0, %v39_v16, %v43_v15  ;;  %v198_v30 = vld [vmem:[#allocation6 + $0x48] sm:$0xff]  ;;  %v197_v31 = vld [vmem:[#allocation6 + $0x40] sm:$0xff]  ;;  %v196_v32 = vld [vmem:[#allocation6 + $0x38] sm:$0xff]  ;;  %vm193_vm7 = vcmask 1040384   ;;  %vm297_vm8 = vcmask 64512   ;;  %vm393_vm9 = vcmask 1042432  }
  0x23   :  { %870 = vmatprep.subr.mxu0 %v85_v11  ;;  %898 = vmatprep.mubr.msk.f32.mxu1 %vm996_vm4, %v995_v26  ;;  %v195_v33 = vld [vmem:[#allocation6 + $0x30] sm:$0xff]  ;;  %v296_v57 = vld [vmem:[#allocation6 + $0x68] sm:$0xff]  ;;  %v431_v16 = vld [vmem:[#allocation6 + $0xc0] sm:$0xff]  ;;  %s997_s21 = smov 112   ;;  %s998_s22 = smov 56   ;;  %vm443_vm10 = vcmask 326656  }
  0x24   :  { %66 = vrot.lane.b32.xlu0 %v52_v2, %s993_s0  ;;  %871 = vmatpush3.msra.mxu0 %v85_v11  ;;  %v283_v3 = vld [vmem:[#allocation6 + $0x70] sm:$0x3]  ;;  %v436_v11 = vld [vmem:[#allocation6 + $0xe8] sm:$0xff]  ;;  %vm420_vm11 = vcmask 916480   ;;  %vm516_vm12 = vcmask 390144   ;;  %s999_s23 = smov 96  }
  0x25   :  { %872 = vmatprep.subr.mxu0 %v84_v12  ;;  %897 = vmatpush3.msra.mxu1 %v296_v57  ;;  %v437_v10 = vld [vmem:[#allocation6 + $0xf0] sm:$0xff]  ;;  %vm728_vm13 = vcmask 128000  }
  0x26   :  { %73 = vrot.lane.b32.xlu1 %v60_v8, %s994_s1  ;;  %873 = vmatpush3.msra.mxu0 %v84_v12  ;;  %v435_v12 = vld [vmem:[#allocation6 + $0xe0] sm:$0xff]  ;;  %v433_v14 = vld [vmem:[#allocation6 + $0xd0] sm:$0xff] }
  0x27   :  { %874 = vmatprep.subr.mxu0 %v83_v13  ;;  %446 = vmatprep.subr.mxu1 %v995_v26 }
  0x28   :  { %875 = vmatpush3.msra.mxu0 %v83_v13  ;;  %v434_v13 = vld [vmem:[#allocation6 + $0xd8] sm:$0xff] }
  0x29   :  { %879 = vmatprep.subr.mxu0 %v995_v26 }
  0x92   :  { %v65_v18 = vpop.permute.xlu0 %64 }
  0x93   :  { %v78_v19 = vsel %vm77_vm1, %v46_v17, %v65_v18  ;;  %v430_v17 = vld [vmem:[#allocation6 + $0xb8] sm:$0xff]  ;;  %v429_v18 = vld [vmem:[#allocation6 + $0xb0] sm:$0xff] }
  0x94   :  { %v72_v20 = vpop.permute.xlu1 %71 }
  0x95   :  { %v81_v21 = vsel %vm80_vm2, %v78_v19, %v72_v20  ;;  %v428_v19 = vld [vmem:[#allocation6 + $0xa8] sm:$0xff]  ;;  %v427_v20 = vld [vmem:[#allocation6 + $0xa0] sm:$0xff] }
  0x96   :  { %876 = vmatprep.mubr.msk.f32.mxu0 %vm89_vm3, %v81_v21  ;;  %v67_v22 = vpop.permute.xlu0 %66  ;;  %v426_v21 = vld [vmem:[#allocation6 + $0x98] sm:$0xff] }
  0x97   :  { %v79_v23 = vsel %vm77_vm1, %v43_v15, %v67_v22  ;;  %v432_v15 = vld [vmem:[#allocation6 + $0xc8] sm:$0xff]  ;;  %v425_v22 = vld [vmem:[#allocation6 + $0x90] sm:$0xff] }
  0x98   :  { %v74_v24 = vpop.permute.xlu1 %73 }
  0x99   :  { %v82_v25 = vsel %vm80_vm2, %v79_v23, %v74_v24  ;;  %v424_v23 = vld [vmem:[#allocation6 + $0x88] sm:$0xff]  ;;  %v423_v24 = vld [vmem:[#allocation6 + $0x80] sm:$0xff] }
  0x9a   :  { %877 = vmatmul.mubr.msk.f32.vlgmr.msra.gmra.mxu0 %vm89_vm3, %v82_v25  ;;  %v422_v25 = vld [vmem:[#allocation6 + $0x78] sm:$0xff] }
  0x9b   :  { %880 = vmatpush3.msra.mxu0 %v201_v27  ;;  %893 = vmatprep.mubr.msk.f32.mxu0 %vm996_vm4, %v995_v26  ;;  %v442_v27 = vld [vmem:[#allocation6 + $0x118] sm:$0xff] }
  0x9c   :  { %881 = vmatprep.subr.mxu0 %v995_v26 }
  0x9d   :  { %882 = vmatpush3.msra.mxu0 %v200_v28  ;;  %v441_v28 = vld [vmem:[#allocation6 + $0x110] sm:$0xff] }
  0x9e   :  { %883 = vmatprep.subr.mxu0 %v995_v26 }
  0x9f   :  { %884 = vmatpush3.msra.mxu0 %v199_v29  ;;  %v440_v29 = vld [vmem:[#allocation6 + $0x108] sm:$0xff] }
  0xa0   :  { %885 = vmatprep.subr.mxu0 %v995_v26 }
  0xa1   :  { %886 = vmatpush3.msra.mxu0 %v198_v30  ;;  %v439_v30 = vld [vmem:[#allocation6 + $0x100] sm:$0xff] }
  0xa2   :  { %887 = vmatprep.subr.mxu0 %v995_v26 }
  0xa3   :  { %888 = vmatpush3.msra.mxu0 %v197_v31  ;;  %v371_v31 = vlaneseq }
  0xa4   :  { %889 = vmatprep.subr.mxu0 %v995_v26 }
  0xa5   :  { %890 = vmatpush3.msra.mxu0 %v196_v32  ;;  %v1081_v32 = vshrl.u32 %v371_v31, 7 }
  0xa6   :  { %891 = vmatprep.subr.mxu0 %v995_v26 }
  0xa7   :  { %892 = vmatpush3.msra.mxu0 %v195_v33  ;;  %v373_v33 = vsub.s32 0, %v1081_v32 }
  0xa8   :  { %901 = vmatprep.subr.mxu0 %v995_v26 }
 0x15a   :  { %v1041_v34 = vpop.f32.mrf.mxu0 }
 0x15b   :  { %v183_v35 = vmul.f32 %v1041_v34, %v1041_v34  ;;  %v174_v37 = vsel %vm173_vm5, %v1041_v34, 0.0 }
 0x15c   :  { %v1045_v36 = vpop.f32.mrf.mxu0 }
 0x15d   :  { %v172_v38 = vsel %vm171_vm6, %v1045_v36, 0.0  ;;  %v182_v39 = vmul.f32 %v1045_v36, %v1045_v36  ;;  %v185_v41 = vsel %vm173_vm5, %v183_v35, 0.0  ;;  %v379_v35 = vsub.s32 1, %v1081_v32  ;;  %v831_v32 = vld [vmem:[#allocation6 + $0x178] ss:$0 sm:$0xff] }
 0x15e   :  { %v175_v40 = vadd.f32 %v174_v37, %v172_v38 }
 0x15f   :  { %v184_v42 = vsel %vm171_vm6, %v182_v39, 0.0 }
 0x160   :  { %v176_v43 = vrot.slane %v175_v40, 4  ;;  %v186_v44 = vadd.f32 %v185_v41, %v184_v42 }
 0x162   :  { %v177_v45 = vadd.f32 %v176_v43, %v175_v40  ;;  %v187_v46 = vrot.slane %v186_v44, 4 }
 0x164   :  { %v178_v47 = vrot.slane %v177_v45, 2  ;;  %v188_v48 = vadd.f32 %v187_v46, %v186_v44 }
 0x166   :  { %v179_v49 = vadd.f32 %v178_v47, %v177_v45  ;;  %v189_v50 = vrot.slane %v188_v48, 2  ;;  %v438_v47 = vld [vmem:[#allocation6 + $0xf8] sm:$0xff] }
 0x168   :  { %v180_v51 = vrot.slane %v179_v49, 1  ;;  %v190_v52 = vadd.f32 %v189_v50, %v188_v48 }
 0x16a   :  { %v191_v53 = vrot.slane %v190_v52, 1  ;;  %v181_v54 = vadd.f32 %v180_v51, %v179_v49 }
 0x16c   :  { %v192_v55 = vadd.f32 %v191_v53, %v190_v52 }
 0x16e   :  { %v194_v56 = vsel %vm193_vm7, %v181_v54, %v192_v55 }
 0x16f   :  { %894 = vmatmul.mubr.msk.f32.vlgmr.msra.gmra.mxu0 %vm171_vm6, %v194_v56 }
 0x170   :  { %913 = vmatprep.mubr.msk.f32.mxu0 %vm996_vm4, %v995_v26 }
 0x22f   :  { %v271_v58 = vpop.f32.mrf.mxu0 }
 0x230   :  { %v276_v59 = vmul.f32 0.010204081, %v271_v58 }
 0x231   :  { %v895_v60 = vpop.f32.mrf.mxu0 }
 0x232   :  { %v277_v61 = vmul.f32 %v276_v59, %v276_v59 }
 0x234   :  { %v279_v62 = vrot.slane %v277_v61, 7 }
 0x236   :  { %v281_v63 = vsub.f32 %v276_v59, %v279_v62  ;;  %v538_v62 = vld [vmem:[#allocation6 + $0x148] sm:$0xff] }
 0x237   :  { %902 = vmatpush3.msra.mxu0 %v538_v62 }
 0x238   :  { %v282_v0 = vmax.f32 %v281_v63, 0.0  ;;  %903 = vmatprep.subr.mxu0 %v995_v26  ;;  %v537_v63 = vld [vmem:[#allocation6 + $0x140] sm:$0xff] }
 0x239   :  { %904 = vmatpush3.msra.mxu0 %v537_v63 }
 0x23a   :  { %v284_v1 = vadd.f32 1e-05, %v282_v0  ;;  %905 = vmatprep.subr.mxu0 %v995_v26  ;;  %v536_v0 = vld [vmem:[#allocation6 + $0x138] sm:$0xff] }
 0x23b   :  { %906 = vmatpush3.msra.mxu0 %v536_v0 }
 0x23c   :  { %941 = vrsqrt.f32 %v284_v1  ;;  %907 = vmatprep.subr.mxu0 %v995_v26  ;;  %v535_v1 = vld [vmem:[#allocation6 + $0x130] sm:$0xff] }
 0x23d   :  { %908 = vmatpush3.msra.mxu0 %v535_v1 }
 0x23e   :  { %909 = vmatprep.subr.mxu0 %v995_v26 }
 0x249   :  { %v942_v2 = vpop.eup %941 }
 0x24a   :  { %v287_v4 = vrot.slane %v942_v2, 1  ;;  %v534_v2 = vld [vmem:[#allocation6 + $0x128] sm:$0xff] }
 0x24b   :  { %910 = vmatpush3.msra.mxu0 %v534_v2 }
 0x24c   :  { %v289_v5 = vmul.f32 %v287_v4, %v283_v3  ;;  %911 = vmatprep.subr.mxu0 %v995_v26 }
 0x24e   :  { %v290_v6 = vmul.f32 %v289_v5, %v276_v59 }
 0x250   :  { %v292_v7 = vrot.slane %v290_v6, 7 }
 0x252   :  { %v294_v8 = vsub.f32 %v283_v3, %v292_v7  ;;  %v533_v3 = vld [vmem:[#allocation6 + $0x120] sm:$0xff] }
 0x253   :  { %912 = vmatpush3.msra.mxu0 %v533_v3 }
 0x254   :  { %v295_v9 = vsel %vm193_vm7, %v289_v5, %v294_v8  ;;  %916 = vmatprep.subr.mxu0 %v995_v26 }
 0x255   :  { %899 = vmatmul.mubr.msk.f32.vlgmr.msra.gmra.mxu1 %vm297_vm8, %v295_v9 }
 0x256   :  { %447 = vmatpush1.msra.mxu1 %v437_v10 }
 0x257   :  { %448 = vmatprep.subr.mxu1 %v995_v26 }
 0x258   :  { %449 = vmatpush1.msra.mxu1 %v436_v11 }
 0x259   :  { %450 = vmatprep.subr.mxu1 %v995_v26 }
 0x25a   :  { %451 = vmatpush1.msra.mxu1 %v435_v12 }
 0x25b   :  { %452 = vmatprep.subr.mxu1 %v995_v26 }
 0x25c   :  { %453 = vmatpush1.msra.mxu1 %v434_v13 }
 0x25d   :  { %454 = vmatprep.subr.mxu1 %v995_v26 }
 0x25e   :  { %455 = vmatpush1.msra.mxu1 %v433_v14 }
 0x25f   :  { %456 = vmatprep.subr.mxu1 %v995_v26 }
 0x260   :  { %457 = vmatpush1.msra.mxu1 %v432_v15 }
 0x261   :  { %458 = vmatprep.subr.mxu1 %v995_v26 }
 0x262   :  { %459 = vmatpush1.msra.mxu1 %v431_v16 }
 0x263   :  { %460 = vmatprep.subr.mxu1 %v995_v26 }
 0x264   :  { %461 = vmatpush1.msra.mxu1 %v430_v17 }
 0x265   :  { %462 = vmatprep.subr.mxu1 %v995_v26 }
 0x266   :  { %463 = vmatpush1.msra.mxu1 %v429_v18 }
 0x267   :  { %464 = vmatprep.subr.mxu1 %v995_v26 }
 0x268   :  { %465 = vmatpush1.msra.mxu1 %v428_v19 }
 0x269   :  { %466 = vmatprep.subr.mxu1 %v995_v26 }
 0x26a   :  { %467 = vmatpush1.msra.mxu1 %v427_v20 }
 0x26b   :  { %468 = vmatprep.subr.mxu1 %v995_v26 }
 0x26c   :  { %469 = vmatpush1.msra.mxu1 %v426_v21 }
 0x26d   :  { %470 = vmatprep.subr.mxu1 %v995_v26 }
 0x26e   :  { %471 = vmatpush1.msra.mxu1 %v425_v22  ;;  %v634_v22 = vld [vmem:[#allocation6 + $0x158] sm:$0xff] }
 0x26f   :  { %472 = vmatprep.subr.mxu1 %v995_v26 }
 0x270   :  { %473 = vmatpush1.msra.mxu1 %v424_v23  ;;  %v633_v23 = vld [vmem:[#allocation6 + $0x150] sm:$0xff] }
 0x271   :  { %474 = vmatprep.subr.mxu1 %v995_v26 }
 0x272   :  { %475 = vmatpush1.msra.mxu1 %v423_v24 }
 0x273   :  { %476 = vmatprep.subr.mxu1 %v995_v26 }
 0x274   :  { %477 = vmatpush1.msra.mxu1 %v422_v25 }
 0x275   :  { %500 = vmatprep.subr.mxu1 %v995_v26 }
 0x276   :  { %501 = vmatpush2.msra.mxu1 %v442_v27 }
 0x277   :  { %502 = vmatprep.subr.mxu1 %v995_v26 }
 0x278   :  { %503 = vmatpush2.msra.mxu1 %v441_v28 }
 0x279   :  { %504 = vmatprep.subr.mxu1 %v995_v26 }
 0x27a   :  { %505 = vmatpush2.msra.mxu1 %v440_v29 }
 0x27b   :  { %506 = vmatprep.subr.mxu1 %v995_v26 }
 0x27c   :  { %507 = vmatpush2.msra.mxu1 %v439_v30 }
 0x27d   :  { %508 = vmatprep.subr.mxu1 %v995_v26 }
 0x27e   :  { %509 = vmatpush2.msra.mxu1 %v438_v47  ;;  %v738_v47 = vld [vmem:[#allocation6 + $0x170] sm:$0xff] }
 0x315   :  { %v367_v37 = vpop.f32.mrf.mxu1 }
 0x316   :  { %v374_v38 = vrot.slane %v367_v37, %v373_v33  ;;  %v380_v42 = vrot.slane %v367_v37, %v379_v35 }
 0x317   :  { %v900_v39 = vpop.f32.mrf.mxu1 }
 0x318   :  { %v375_v40 = vmul.f32 %v374_v38, %v1045_v36  ;;  %v376_v41 = vmul.f32 %v1041_v34, %v374_v38  ;;  %v620_v39 = vld [vmem:[#allocation6 + $0x160] sm:$0x3] }
 0x31a   :  { %v381_v43 = vadd.f32 %v380_v42, %v375_v40  ;;  %v382_v44 = vadd.f32 %v380_v42, %v376_v41 }
 0x31c   :  { %v383_v45 = vmax.f32 %v381_v43, 0.0  ;;  %v384_v46 = vmax.f32 %v382_v44, 0.0 }
 0x31e   :  { %385 = vst.msk [vmem:[#allocation2] sm:$0xff] %vm171_vm6, %v383_v45 }
 0x31f   :  { %386 = vst.msk [vmem:[#allocation2 + $0x8] sm:$0x3f] %vm173_vm5, %v384_v46 }
 0x325   :  { %v404_v50 = vld [vmem:[#allocation2 + $0x2] ss:$2 sm:$0x7]  ;;  %v396_v52 = vld [vmem:[#allocation2 + $0x1] ss:$2 sm:$0x7] }
 0x326   :  { %v406_v48 = vld [vmem:[#allocation2 + $0x9] ss:$2 sm:$0x7]  ;;  %v398_v36 = vld [vmem:[#allocation2 + $0x8] ss:$2 sm:$0x7] }
 0x327   :  { %v408_v49 = vrot.slane %v406_v48, 5  ;;  %v400_v51 = vrot.slane %v398_v36, 5  ;;  %v389_v54 = vld [vmem:[#allocation2 + $0x7] ss:$2 sm:$0x7] }
 0x328   :  { %v391_v55 = vrot.slane %v389_v54, 5  ;;  %v387_v57 = vld [vmem:[#allocation2] ss:$2 sm:$0x7] }
 0x329   :  { %v410_v34 = vsel %vm393_vm9, %v404_v50, %v408_v49  ;;  %v402_v53 = vsel %vm393_vm9, %v396_v52, %v400_v51  ;;  %v737_v48 = vld [vmem:[#allocation6 + $0x168] sm:$0xff] }
 0x32a   :  { %416 = vrot.lane.b32.xlu1 %v410_v34, %s997_s21  ;;  %412 = vrot.lane.b32.xlu0 %v402_v53, %s998_s22  ;;  %v394_v59 = vsel %vm393_vm9, %v387_v57, %v391_v55 }
 0x39c   :  { %v417_v56 = vpop.permute.xlu1 %416  ;;  %v413_v58 = vpop.permute.xlu0 %412 }
 0x39d   :  { %828 = vmatprep.mubr.msk.f32.mxu1 %vm443_vm10, %v417_v56  ;;  %v419_v60 = vsel %vm171_vm6, %v394_v59, %v413_v58 }
 0x39e   :  { %v421_v61 = vsel %vm420_vm11, %v419_v60, %v417_v56 }
 0x39f   :  { %511 = vmatmul.mubr.f32.vlgmr.msra.gmra.mxu1 %v421_v61 }
 0x45f   :  { %v512_v4 = vpop.f32.mrf.mxu1 }
 0x460   :  { %v517_v5 = vsel %vm516_vm12, %v512_v4, 0.0  ;;  %v524_v6 = vmul.f32 %v512_v4, %v512_v4 }
 0x461   :  { %v518_v7 = vrot.slane %v517_v5, 4  ;;  %v514_v8 = vpop.f32.mrf.mxu1 }
 0x462   :  { %v525_v9 = vsel %vm516_vm12, %v524_v6, 0.0 }
 0x463   :  { %v519_v10 = vadd.f32 %v518_v7, %v517_v5  ;;  %v526_v11 = vrot.slane %v525_v9, 4 }
 0x465   :  { %v520_v12 = vrot.slane %v519_v10, 2  ;;  %v527_v13 = vadd.f32 %v526_v11, %v525_v9 }
 0x467   :  { %v521_v14 = vadd.f32 %v520_v12, %v519_v10  ;;  %v528_v15 = vrot.slane %v527_v13, 2 }
 0x469   :  { %v522_v16 = vrot.slane %v521_v14, 1  ;;  %v529_v17 = vadd.f32 %v528_v15, %v527_v13 }
 0x46b   :  { %v530_v18 = vrot.slane %v529_v17, 1  ;;  %v523_v19 = vadd.f32 %v522_v16, %v521_v14 }
 0x46d   :  { %v531_v20 = vadd.f32 %v530_v18, %v529_v17 }
 0x46f   :  { %v532_v21 = vsel %vm193_vm7, %v523_v19, %v531_v20 }
 0x470   :  { %914 = vmatmul.mubr.msk.f32.vlgmr.msra.gmra.mxu0 %vm89_vm3, %v532_v21 }
 0x471   :  { %920 = vmatprep.mubr.msk.f32.mxu0 %vm996_vm4, %v995_v26  ;;  %917 = vmatpush3.msra.mxu0 %v634_v22 }
 0x472   :  { %918 = vmatprep.subr.mxu0 %v995_v26 }
 0x473   :  { %919 = vmatpush3.msra.mxu0 %v633_v23 }
 0x474   :  { %923 = vmatprep.subr.mxu0 %v995_v26 }
 0x530   :  { %v608_v24 = vpop.f32.mrf.mxu0 }
 0x531   :  { %v613_v25 = vmul.f32 0.055555556, %v608_v24 }
 0x532   :  { %v915_v27 = vpop.f32.mrf.mxu0 }
 0x533   :  { %v614_v28 = vmul.f32 %v613_v25, %v613_v25 }
 0x535   :  { %v616_v29 = vrot.slane %v614_v28, 7 }
 0x537   :  { %v618_v30 = vsub.f32 %v613_v25, %v616_v29 }
 0x539   :  { %v619_v31 = vmax.f32 %v618_v30, 0.0 }
 0x53b   :  { %v621_v37 = vadd.f32 1e-05, %v619_v31 }
 0x53d   :  { %943 = vrsqrt.f32 %v621_v37 }
 0x54a   :  { %v944_v38 = vpop.eup %943 }
 0x54b   :  { %v624_v40 = vrot.slane %v944_v38, 1 }
 0x54d   :  { %v626_v41 = vmul.f32 %v624_v40, %v620_v39 }
 0x54f   :  { %v627_v42 = vmul.f32 %v626_v41, %v613_v25 }
 0x551   :  { %v629_v43 = vrot.slane %v627_v42, 7 }
 0x553   :  { %v631_v44 = vsub.f32 %v620_v39, %v629_v43 }
 0x555   :  { %v632_v45 = vsel %vm193_vm7, %v626_v41, %v631_v44 }
 0x556   :  { %921 = vmatmul.mubr.msk.f32.vlgmr.msra.gmra.mxu0 %vm77_vm1, %v632_v45 }
 0x557   :  { %927 = vmatprep.mubr.msk.f32.mxu0 %vm996_vm4, %v995_v26  ;;  %924 = vmatpush3.msra.mxu0 %v738_v47 }
 0x558   :  { %925 = vmatprep.subr.mxu0 %v995_v26 }
 0x559   :  { %926 = vmatpush3.msra.mxu0 %v737_v48 }
 0x616   :  { %v704_v46 = vpop.f32.mrf.mxu0 }
 0x617   :  { %v711_v49 = vrot.slane %v704_v46, %v373_v33  ;;  %v716_v34 = vrot.slane %v704_v46, %v379_v35 }
 0x618   :  { %v922_v50 = vpop.f32.mrf.mxu0 }
 0x619   :  { %v712_v36 = vmul.f32 %v711_v49, %v512_v4 }
 0x61b   :  { %v717_v51 = vadd.f32 %v716_v34, %v712_v36 }
 0x61d   :  { %v718_v52 = vmax.f32 %v717_v51, 0.0 }
 0x61f   :  { %724 = vrot.lane.b32.xlu1 %v718_v52, %s999_s23  ;;  %720 = vrot.lane.b32.xlu0 %v718_v52, %s997_s21 }
 0x691   :  { %v721_v53 = vpop.permute.xlu0 %720  ;;  %v725_v55 = vpop.permute.xlu1 %724 }
 0x692   :  { %v723_v54 = vmax.f32 %v718_v52, %v721_v53 }
 0x694   :  { %v727_v33 = vmax.f32 %v723_v54, %v725_v55 }
 0x696   :  { %729 = vst.msk [vmem:[#allocation3] sm:$0x3f] %vm728_vm13, %v727_v33 }
 0x69d   :  { %v730_v56 = vld [vmem:[#allocation3] ss:$3 sm:$0x3]  ;;  %v732_v57 = vld [vmem:[#allocation3 + $0x1] ss:$3 sm:$0x3] }
 0x69e   :  { %v733_v26 = vmax.f32 %v730_v56, %v732_v57  ;;  %v735_v58 = vld [vmem:[#allocation3 + $0x2] ss:$3 sm:$0x3] }
 0x6a0   :  { %v736_v59 = vmax.f32 %v733_v26, %v735_v58 }
 0x6a2   :  { %928 = vmatmul.mubr.msk.f32.vlgmr.msra.gmra.mxu0 %vm77_vm1, %v736_v59 }
 0x762   :  { %v813_v35 = vpop.f32.mrf.mxu0 }
 0x763   :  { %v814_v60 = vadd.f32 %v831_v32, %v813_v35 }
 0x764   :  { %v929_v61 = vpop.f32.mrf.mxu0 }
 0x765   :  { %817 = vst [vmem:[%s1126_s2] sm:$0x3] %v814_v60 }
 0x766   :  { %822 = vsyncpa [#allocation5], 1 }
 0x767   :  { %823 = vsyncpa [#allocation7], 1 }

</bundles_post_ra>
